<compile_context>
chip_gen: v7x
topology: tpu7x:2x2x1
jax: 0.10.0
libtpu: 0.0.40
codegen_flags: <defaults>
</compile_context>

<pallas_src>
import functools

import jax
import jax.numpy as jnp
from jax import lax
from jax.experimental import pallas as pl
from jax.experimental.pallas import tpu as pltpu

EPS = 1e-5


# ----------------------------------------------------------------------------
# Fused Pallas kernel: whole forward pass in one invocation
# ----------------------------------------------------------------------------
def fused_gnn_kernel(a_ref, x_ref, w0_ref, wrest_ref, gamma_ref, beta_ref,
                     p_ref, lw_ref, lb_ref, o_ref, *, num_layers, inv_n):
    """Ref layout (all VMEM, full-array blocks):

      a_ref     : A        (N, N)           dense adjacency, A[d, s] = #edges s->d
      x_ref     : x        (N, F)           node features
      w0_ref    : Wcat_0   (2*F, H)         layer-0 stacked [W_rel^T ; W_root^T]
      wrest_ref : Wcat_1.. (L-1, 2*H, H)    remaining layers' stacked weights
      gamma_ref : gammas   (L, H)           BN scales, one row per layer
      beta_ref  : betas    (L, H)           BN shifts, one row per layer
      p_ref     : P        (B, N)           normalized mean-pool matrix
      lw_ref    : lin_w    (H, C)           final Linear weight (transposed)
      lb_ref    : lin_b    (1, C)           final Linear bias
      o_ref     : out      (B, C)           output
    """
    a = a_ref[...]
    x = x_ref[...]

    for l in range(num_layers):  # unrolled at trace time; x stays in VMEM/vregs
        wcat = w0_ref[...] if l == 0 else wrest_ref[l - 1]
        gamma = gamma_ref[l:l + 1, :]
        beta = beta_ref[l:l + 1, :]

        # Neighbor "add" aggregation (MXU), then ONE K-packed projection matmul:
        #   h = [A@x | x] @ [W_rel^T ; W_root^T]
        aggr = jnp.dot(a, x, preferred_element_type=jnp.float32)
        h = jnp.dot(jnp.concatenate([aggr, x], axis=1), wcat,
                    preferred_element_type=jnp.float32)
        # (lin_rel bias omitted: cancelled exactly by training-mode BN below.)

        # BatchNorm1d training stats (biased variance) in a single pass,
        # folded to one scale/shift, fused with ReLU.
        s1 = jnp.sum(h, axis=0, keepdims=True)
        s2 = jnp.sum(h * h, axis=0, keepdims=True)
        mean = s1 * inv_n
        var = s2 * inv_n - mean * mean
        scale = gamma * lax.rsqrt(var + EPS)     # rsqrt -> EUP (free slot)
        shift = beta - mean * scale
        x = jnp.maximum(h * scale + shift, 0.0)

    # global_mean_pool (P @ x) + final Linear, fused as the kernel epilogue.
    pooled = jnp.dot(p_ref[...], x, preferred_element_type=jnp.float32)
    o_ref[...] = (jnp.dot(pooled, lw_ref[...],
                          preferred_element_type=jnp.float32) + lb_ref[...])


# ----------------------------------------------------------------------------
# Wrapper
# ----------------------------------------------------------------------------
def _full_spec(shape):
    return pl.BlockSpec(shape, lambda i: (0,) * len(shape))


def gnn_forward(x, adj, pool_mat, params):
    layers = params["layers"]
    num_layers = len(layers)
    assert num_layers >= 2, "GNN always has conv1..conv3 -> >= 3 layers"
    n = adj.shape[0]
    hdim = layers[0]["wcat"].shape[1]
    bsz = pool_mat.shape[0]
    c = params["lin_w"].shape[1]

    # Stack small per-layer params into a few dense arrays (fewer DMA refs).
    w0 = layers[0]["wcat"]                                       # (2F, H)
    wrest = jnp.stack([l["wcat"] for l in layers[1:]], axis=0)   # (L-1, 2H, H)
    gammas = jnp.concatenate([l["gamma"] for l in layers], axis=0)  # (L, H)
    betas = jnp.concatenate([l["beta"] for l in layers], axis=0)    # (L, H)

    inputs = [adj, x, w0, wrest, gammas, betas,
              pool_mat, params["lin_w"], params["lin_b"]]
    in_specs = [_full_spec(t.shape) for t in inputs]

    # Advisory cost estimate for XLA's scheduler.
    flops = 0
    for layer in layers:
        k2 = layer["wcat"].shape[0]          # 2 * Fin_l
        flops += 2 * n * n * (k2 // 2)       # A @ x
        flops += 2 * n * k2 * hdim           # [aggr | x] @ Wcat
    flops += 2 * bsz * n * hdim + 2 * bsz * hdim * c
    bytes_accessed = 4 * (sum(int(t.size) for t in inputs) + bsz * c)

    kernel = functools.partial(fused_gnn_kernel,
                               num_layers=num_layers, inv_n=float(1.0 / n))
    return pl.pallas_call(
        kernel,
        out_shape=jax.ShapeDtypeStruct((bsz, c), jnp.float32),
        grid=(1,),
        in_specs=in_specs,
        out_specs=_full_spec((bsz, c)),
        compiler_params=pltpu.CompilerParams(
            dimension_semantics=("arbitrary",)),
        cost_estimate=pl.CostEstimate(
            flops=flops, transcendentals=num_layers * hdim,
            bytes_accessed=bytes_accessed),
    )(*inputs)


# ----------------------------------------------------------------------------
# Deterministic parameter construction (mirrors shapes from GNN.__init__)
# ----------------------------------------------------------------------------
def _linear_params(key, fan_in, fan_out, bias=True):
    """torch.nn.Linear-style uniform(-1/sqrt(fan_in), 1/sqrt(fan_in)) init."""
    kw, kb = jax.random.split(key)
    bound = 1.0 / jnp.sqrt(jnp.float32(fan_in))
    w = jax.random.uniform(kw, (fan_in, fan_out), jnp.float32, -bound, bound)
    b = (jax.random.uniform(kb, (1, fan_out), jnp.float32, -bound, bound)
         if bias else None)
    return w, b


def make_graphconv_params(key, fan_in, fan_out):
    k1, k2 = jax.random.split(key)
    # lin_rel's bias is cancelled exactly by the training-mode BatchNorm that
    # follows, so it is not materialized / passed into the kernel.
    wrel, _ = _linear_params(k1, fan_in, fan_out, bias=True)
    wroot, _ = _linear_params(k2, fan_in, fan_out, bias=False)
    wcat = jnp.concatenate([wrel, wroot], axis=0)       # (2*fan_in, fan_out)
    gamma = jnp.ones((1, fan_out), jnp.float32)         # BN affine defaults
    beta = jnp.zeros((1, fan_out), jnp.float32)
    return dict(wcat=wcat, gamma=gamma, beta=beta)


# ----------------------------------------------------------------------------
# Example run
# ----------------------------------------------------------------------------
if __name__ == "__main__":
    # Small synthetic graph batch consistent with the module's forward:
    #   N nodes total, num_node_features=4, hidden_channels=32,
    #   num_classes=3, num_layers=2 extra GraphConv layers, 2 graphs in batch.
    N = 16
    NUM_NODE_FEATURES = 4
    HIDDEN = 32
    NUM_CLASSES = 3
    NUM_LAYERS = 2          # extra ModuleList GraphConv/BN layers
    NUM_GRAPHS = 2
    NUM_EDGES = 48

    root = jax.random.PRNGKey(0)
    k_x, k_src, k_dst, k_p = jax.random.split(root, 4)

    # Node features.
    x = jax.random.normal(k_x, (N, NUM_NODE_FEATURES), jnp.float32)

    # edge_index (2, E): row 0 = source, row 1 = destination, kept within-graph.
    half = N // NUM_GRAPHS
    src0 = jax.random.randint(k_src, (NUM_EDGES // 2,), 0, half)
    dst0 = jax.random.randint(k_dst, (NUM_EDGES // 2,), 0, half)
    src = jnp.concatenate([src0, src0 + half])
    dst = jnp.concatenate([dst0, dst0 + half])

    # Dense adjacency for "add" aggregation: A[dst, src] accumulates multi-edges.
    adj = jnp.zeros((N, N), jnp.float32).at[dst, src].add(1.0)

    # batch vector -> normalized pooling matrix P (B, N) for global_mean_pool.
    batch = jnp.concatenate([jnp.zeros((half,), jnp.int32),
                             jnp.ones((half,), jnp.int32)])
    onehot = (batch[None, :] == jnp.arange(NUM_GRAPHS)[:, None]).astype(jnp.float32)
    counts = jnp.sum(onehot, axis=1, keepdims=True)
    pool_mat = onehot / counts

    # Parameters (deterministic, shapes mirror GNN.__init__).
    pkeys = jax.random.split(k_p, 3 + NUM_LAYERS + 1)
    layers = [
        make_graphconv_params(pkeys[0], NUM_NODE_FEATURES, HIDDEN),  # conv1/bn1
        make_graphconv_params(pkeys[1], HIDDEN, HIDDEN),             # conv2/bn2
        make_graphconv_params(pkeys[2], HIDDEN, HIDDEN),             # conv3/bn3
    ] + [
        make_graphconv_params(pkeys[3 + i], HIDDEN, HIDDEN)          # ModuleList
        for i in range(NUM_LAYERS)
    ]
    lin_w, lin_b = _linear_params(pkeys[-1], HIDDEN, NUM_CLASSES, bias=True)

    params = dict(layers=layers, lin_w=lin_w, lin_b=lin_b)

    out = gnn_forward(x, adj, pool_mat, params)
    jax.block_until_ready(out)

    assert out.shape == (NUM_GRAPHS, NUM_CLASSES)
    assert bool(jnp.all(jnp.isfinite(out)))
    print("KERNEL_OK")
</pallas_src>

<mosaic_0001>
module attributes {stable_mosaic.version = 11 : i64} {
  func.func @fused_gnn_kernel(%arg0: i32, %arg1: memref<16x16xf32, #tpu.memory_space<vmem>>, %arg2: memref<16x4xf32, #tpu.memory_space<vmem>>, %arg3: memref<8x32xf32, #tpu.memory_space<vmem>>, %arg4: memref<4x64x32xf32, #tpu.memory_space<vmem>>, %arg5: memref<5x32xf32, #tpu.memory_space<vmem>>, %arg6: memref<5x32xf32, #tpu.memory_space<vmem>>, %arg7: memref<2x16xf32, #tpu.memory_space<vmem>>, %arg8: memref<32x3xf32, #tpu.memory_space<vmem>>, %arg9: memref<1x3xf32, #tpu.memory_space<vmem>>, %arg10: memref<2x3xf32, #tpu.memory_space<vmem>>) attributes {dimension_semantics = [#tpu.dimension_semantics<arbitrary>], iteration_bounds = array<i64: 1>, scalar_prefetch = 0 : i64, scratch_operands = 0 : i64, tpu.core_type = #tpu.core_type<tc>, window_params = [{pipeline_mode = #tpu.pipeline_mode<synchronous>, transform_indices = @transform_0, window_bounds = array<i64: 16, 16>}, {pipeline_mode = #tpu.pipeline_mode<synchronous>, transform_indices = @transform_1, window_bounds = array<i64: 16, 4>}, {pipeline_mode = #tpu.pipeline_mode<synchronous>, transform_indices = @transform_2, window_bounds = array<i64: 8, 32>}, {pipeline_mode = #tpu.pipeline_mode<synchronous>, transform_indices = @transform_3, window_bounds = array<i64: 4, 64, 32>}, {pipeline_mode = #tpu.pipeline_mode<synchronous>, transform_indices = @transform_4, window_bounds = array<i64: 5, 32>}, {pipeline_mode = #tpu.pipeline_mode<synchronous>, transform_indices = @transform_5, window_bounds = array<i64: 5, 32>}, {pipeline_mode = #tpu.pipeline_mode<synchronous>, transform_indices = @transform_6, window_bounds = array<i64: 2, 16>}, {pipeline_mode = #tpu.pipeline_mode<synchronous>, transform_indices = @transform_7, window_bounds = array<i64: 32, 3>}, {pipeline_mode = #tpu.pipeline_mode<synchronous>, transform_indices = @transform_8, window_bounds = array<i64: 1, 3>}, {pipeline_mode = #tpu.pipeline_mode<synchronous>, transform_indices = @transform_9, window_bounds = array<i64: 2, 3>}]} {
    %c0 = arith.constant 0 : index
    %c0_0 = arith.constant 0 : index
    %0 = vector.load %arg1[%c0, %c0_0] : memref<16x16xf32, #tpu.memory_space<vmem>>, vector<16x16xf32>
    %c0_1 = arith.constant 0 : index
    %c0_2 = arith.constant 0 : index
    %1 = vector.load %arg2[%c0_1, %c0_2] : memref<16x4xf32, #tpu.memory_space<vmem>>, vector<16x4xf32>
    %c0_3 = arith.constant 0 : index
    %c0_4 = arith.constant 0 : index
    %2 = vector.load %arg3[%c0_3, %c0_4] : memref<8x32xf32, #tpu.memory_space<vmem>>, vector<8x32xf32>
    %c0_5 = arith.constant 0 : index
    %c0_6 = arith.constant 0 : index
    %3 = vector.load %arg5[%c0_5, %c0_6] : memref<5x32xf32, #tpu.memory_space<vmem>>, vector<1x32xf32>
    %c0_7 = arith.constant 0 : index
    %c0_8 = arith.constant 0 : index
    %4 = vector.load %arg6[%c0_7, %c0_8] : memref<5x32xf32, #tpu.memory_space<vmem>>, vector<1x32xf32>
    %cst = arith.constant dense<0.000000e+00> : vector<16x4xf32>
    %5 = tpu.matmul %0, %1, %cst {dimension_numbers = #tpu.dot_dimension_numbers<[1], [0], [0], [1], [0, 0, 1, 1], [], []>} : vector<16x16xf32>, vector<16x4xf32>, vector<16x4xf32> -> vector<16x4xf32>
    %6 = tpu.concatenate %5, %1 in 1 : vector<16x4xf32>, vector<16x4xf32> -> vector<16x8xf32>
    %cst_9 = arith.constant dense<0.000000e+00> : vector<16x32xf32>
    %7 = tpu.matmul %6, %2, %cst_9 {dimension_numbers = #tpu.dot_dimension_numbers<[1], [0], [0], [1], [0, 0, 1, 1], [], []>} : vector<16x8xf32>, vector<8x32xf32>, vector<16x32xf32> -> vector<16x32xf32>
    %cst_10 = arith.constant dense<0.000000e+00> : vector<32xf32>
    %8 = vector.multi_reduction <add>, %7, %cst_10 [0] : vector<16x32xf32> to vector<32xf32>
    %9 = vector.shape_cast %8 : vector<32xf32> to vector<1x32xf32>
    %10 = arith.mulf %7, %7 : vector<16x32xf32>
    %cst_11 = arith.constant dense<0.000000e+00> : vector<32xf32>
    %11 = vector.multi_reduction <add>, %10, %cst_11 [0] : vector<16x32xf32> to vector<32xf32>
    %12 = vector.shape_cast %11 : vector<32xf32> to vector<1x32xf32>
    %cst_12 = arith.constant 6.250000e-02 : f32
    %13 = vector.broadcast %cst_12 : f32 to vector<1x32xf32>
    %14 = arith.mulf %9, %13 : vector<1x32xf32>
    %cst_13 = arith.constant 6.250000e-02 : f32
    %15 = vector.broadcast %cst_13 : f32 to vector<1x32xf32>
    %16 = arith.mulf %12, %15 : vector<1x32xf32>
    %17 = arith.mulf %14, %14 : vector<1x32xf32>
    %18 = arith.subf %16, %17 : vector<1x32xf32>
    %cst_14 = arith.constant 9.99999974E-6 : f32
    %19 = vector.broadcast %cst_14 : f32 to vector<1x32xf32>
    %20 = arith.addf %18, %19 : vector<1x32xf32>
    %21 = math.rsqrt %20 : vector<1x32xf32>
    %22 = arith.mulf %3, %21 : vector<1x32xf32>
    %23 = arith.mulf %14, %22 : vector<1x32xf32>
    %24 = arith.subf %4, %23 : vector<1x32xf32>
    %25 = vector.broadcast %22 : vector<1x32xf32> to vector<16x32xf32>
    %26 = arith.mulf %7, %25 : vector<16x32xf32>
    %27 = vector.broadcast %24 : vector<1x32xf32> to vector<16x32xf32>
    %28 = arith.addf %26, %27 : vector<16x32xf32>
    %cst_15 = arith.constant 0.000000e+00 : f32
    %29 = vector.broadcast %cst_15 : f32 to vector<16x32xf32>
    %30 = arith.maximumf %28, %29 : vector<16x32xf32>
    %c0_16 = arith.constant 0 : index
    %c0_17 = arith.constant 0 : index
    %c0_18 = arith.constant 0 : index
    %31 = vector.load %arg4[%c0_16, %c0_17, %c0_18] : memref<4x64x32xf32, #tpu.memory_space<vmem>>, vector<1x64x32xf32>
    %32 = vector.shape_cast %31 : vector<1x64x32xf32> to vector<64x32xf32>
    %c1 = arith.constant 1 : index
    %c0_19 = arith.constant 0 : index
    %33 = vector.load %arg5[%c1, %c0_19] : memref<5x32xf32, #tpu.memory_space<vmem>>, vector<1x32xf32>
    %c1_20 = arith.constant 1 : index
    %c0_21 = arith.constant 0 : index
    %34 = vector.load %arg6[%c1_20, %c0_21] : memref<5x32xf32, #tpu.memory_space<vmem>>, vector<1x32xf32>
    %cst_22 = arith.constant dense<0.000000e+00> : vector<16x32xf32>
    %35 = tpu.matmul %0, %30, %cst_22 {dimension_numbers = #tpu.dot_dimension_numbers<[1], [0], [0], [1], [0, 0, 1, 1], [], []>} : vector<16x16xf32>, vector<16x32xf32>, vector<16x32xf32> -> vector<16x32xf32>
    %36 = tpu.concatenate %35, %30 in 1 : vector<16x32xf32>, vector<16x32xf32> -> vector<16x64xf32>
    %cst_23 = arith.constant dense<0.000000e+00> : vector<16x32xf32>
    %37 = tpu.matmul %36, %32, %cst_23 {dimension_numbers = #tpu.dot_dimension_numbers<[1], [0], [0], [1], [0, 0, 1, 1], [], []>} : vector<16x64xf32>, vector<64x32xf32>, vector<16x32xf32> -> vector<16x32xf32>
    %cst_24 = arith.constant dense<0.000000e+00> : vector<32xf32>
    %38 = vector.multi_reduction <add>, %37, %cst_24 [0] : vector<16x32xf32> to vector<32xf32>
    %39 = vector.shape_cast %38 : vector<32xf32> to vector<1x32xf32>
    %40 = arith.mulf %37, %37 : vector<16x32xf32>
    %cst_25 = arith.constant dense<0.000000e+00> : vector<32xf32>
    %41 = vector.multi_reduction <add>, %40, %cst_25 [0] : vector<16x32xf32> to vector<32xf32>
    %42 = vector.shape_cast %41 : vector<32xf32> to vector<1x32xf32>
    %cst_26 = arith.constant 6.250000e-02 : f32
    %43 = vector.broadcast %cst_26 : f32 to vector<1x32xf32>
    %44 = arith.mulf %39, %43 : vector<1x32xf32>
    %cst_27 = arith.constant 6.250000e-02 : f32
    %45 = vector.broadcast %cst_27 : f32 to vector<1x32xf32>
    %46 = arith.mulf %42, %45 : vector<1x32xf32>
    %47 = arith.mulf %44, %44 : vector<1x32xf32>
    %48 = arith.subf %46, %47 : vector<1x32xf32>
    %cst_28 = arith.constant 9.99999974E-6 : f32
    %49 = vector.broadcast %cst_28 : f32 to vector<1x32xf32>
    %50 = arith.addf %48, %49 : vector<1x32xf32>
    %51 = math.rsqrt %50 : vector<1x32xf32>
    %52 = arith.mulf %33, %51 : vector<1x32xf32>
    %53 = arith.mulf %44, %52 : vector<1x32xf32>
    %54 = arith.subf %34, %53 : vector<1x32xf32>
    %55 = vector.broadcast %52 : vector<1x32xf32> to vector<16x32xf32>
    %56 = arith.mulf %37, %55 : vector<16x32xf32>
    %57 = vector.broadcast %54 : vector<1x32xf32> to vector<16x32xf32>
    %58 = arith.addf %56, %57 : vector<16x32xf32>
    %cst_29 = arith.constant 0.000000e+00 : f32
    %59 = vector.broadcast %cst_29 : f32 to vector<16x32xf32>
    %60 = arith.maximumf %58, %59 : vector<16x32xf32>
    %c1_30 = arith.constant 1 : index
    %c0_31 = arith.constant 0 : index
    %c0_32 = arith.constant 0 : index
    %61 = vector.load %arg4[%c1_30, %c0_31, %c0_32] : memref<4x64x32xf32, #tpu.memory_space<vmem>>, vector<1x64x32xf32>
    %62 = vector.shape_cast %61 : vector<1x64x32xf32> to vector<64x32xf32>
    %c2 = arith.constant 2 : index
    %c0_33 = arith.constant 0 : index
    %63 = vector.load %arg5[%c2, %c0_33] : memref<5x32xf32, #tpu.memory_space<vmem>>, vector<1x32xf32>
    %c2_34 = arith.constant 2 : index
    %c0_35 = arith.constant 0 : index
    %64 = vector.load %arg6[%c2_34, %c0_35] : memref<5x32xf32, #tpu.memory_space<vmem>>, vector<1x32xf32>
    %cst_36 = arith.constant dense<0.000000e+00> : vector<16x32xf32>
    %65 = tpu.matmul %0, %60, %cst_36 {dimension_numbers = #tpu.dot_dimension_numbers<[1], [0], [0], [1], [0, 0, 1, 1], [], []>} : vector<16x16xf32>, vector<16x32xf32>, vector<16x32xf32> -> vector<16x32xf32>
    %66 = tpu.concatenate %65, %60 in 1 : vector<16x32xf32>, vector<16x32xf32> -> vector<16x64xf32>
    %cst_37 = arith.constant dense<0.000000e+00> : vector<16x32xf32>
    %67 = tpu.matmul %66, %62, %cst_37 {dimension_numbers = #tpu.dot_dimension_numbers<[1], [0], [0], [1], [0, 0, 1, 1], [], []>} : vector<16x64xf32>, vector<64x32xf32>, vector<16x32xf32> -> vector<16x32xf32>
    %cst_38 = arith.constant dense<0.000000e+00> : vector<32xf32>
    %68 = vector.multi_reduction <add>, %67, %cst_38 [0] : vector<16x32xf32> to vector<32xf32>
    %69 = vector.shape_cast %68 : vector<32xf32> to vector<1x32xf32>
    %70 = arith.mulf %67, %67 : vector<16x32xf32>
    %cst_39 = arith.constant dense<0.000000e+00> : vector<32xf32>
    %71 = vector.multi_reduction <add>, %70, %cst_39 [0] : vector<16x32xf32> to vector<32xf32>
    %72 = vector.shape_cast %71 : vector<32xf32> to vector<1x32xf32>
    %cst_40 = arith.constant 6.250000e-02 : f32
    %73 = vector.broadcast %cst_40 : f32 to vector<1x32xf32>
    %74 = arith.mulf %69, %73 : vector<1x32xf32>
    %cst_41 = arith.constant 6.250000e-02 : f32
    %75 = vector.broadcast %cst_41 : f32 to vector<1x32xf32>
    %76 = arith.mulf %72, %75 : vector<1x32xf32>
    %77 = arith.mulf %74, %74 : vector<1x32xf32>
    %78 = arith.subf %76, %77 : vector<1x32xf32>
    %cst_42 = arith.constant 9.99999974E-6 : f32
    %79 = vector.broadcast %cst_42 : f32 to vector<1x32xf32>
    %80 = arith.addf %78, %79 : vector<1x32xf32>
    %81 = math.rsqrt %80 : vector<1x32xf32>
    %82 = arith.mulf %63, %81 : vector<1x32xf32>
    %83 = arith.mulf %74, %82 : vector<1x32xf32>
    %84 = arith.subf %64, %83 : vector<1x32xf32>
    %85 = vector.broadcast %82 : vector<1x32xf32> to vector<16x32xf32>
    %86 = arith.mulf %67, %85 : vector<16x32xf32>
    %87 = vector.broadcast %84 : vector<1x32xf32> to vector<16x32xf32>
    %88 = arith.addf %86, %87 : vector<16x32xf32>
    %cst_43 = arith.constant 0.000000e+00 : f32
    %89 = vector.broadcast %cst_43 : f32 to vector<16x32xf32>
    %90 = arith.maximumf %88, %89 : vector<16x32xf32>
    %c2_44 = arith.constant 2 : index
    %c0_45 = arith.constant 0 : index
    %c0_46 = arith.constant 0 : index
    %91 = vector.load %arg4[%c2_44, %c0_45, %c0_46] : memref<4x64x32xf32, #tpu.memory_space<vmem>>, vector<1x64x32xf32>
    %92 = vector.shape_cast %91 : vector<1x64x32xf32> to vector<64x32xf32>
    %c3 = arith.constant 3 : index
    %c0_47 = arith.constant 0 : index
    %93 = vector.load %arg5[%c3, %c0_47] : memref<5x32xf32, #tpu.memory_space<vmem>>, vector<1x32xf32>
    %c3_48 = arith.constant 3 : index
    %c0_49 = arith.constant 0 : index
    %94 = vector.load %arg6[%c3_48, %c0_49] : memref<5x32xf32, #tpu.memory_space<vmem>>, vector<1x32xf32>
    %cst_50 = arith.constant dense<0.000000e+00> : vector<16x32xf32>
    %95 = tpu.matmul %0, %90, %cst_50 {dimension_numbers = #tpu.dot_dimension_numbers<[1], [0], [0], [1], [0, 0, 1, 1], [], []>} : vector<16x16xf32>, vector<16x32xf32>, vector<16x32xf32> -> vector<16x32xf32>
    %96 = tpu.concatenate %95, %90 in 1 : vector<16x32xf32>, vector<16x32xf32> -> vector<16x64xf32>
    %cst_51 = arith.constant dense<0.000000e+00> : vector<16x32xf32>
    %97 = tpu.matmul %96, %92, %cst_51 {dimension_numbers = #tpu.dot_dimension_numbers<[1], [0], [0], [1], [0, 0, 1, 1], [], []>} : vector<16x64xf32>, vector<64x32xf32>, vector<16x32xf32> -> vector<16x32xf32>
    %cst_52 = arith.constant dense<0.000000e+00> : vector<32xf32>
    %98 = vector.multi_reduction <add>, %97, %cst_52 [0] : vector<16x32xf32> to vector<32xf32>
    %99 = vector.shape_cast %98 : vector<32xf32> to vector<1x32xf32>
    %100 = arith.mulf %97, %97 : vector<16x32xf32>
    %cst_53 = arith.constant dense<0.000000e+00> : vector<32xf32>
    %101 = vector.multi_reduction <add>, %100, %cst_53 [0] : vector<16x32xf32> to vector<32xf32>
    %102 = vector.shape_cast %101 : vector<32xf32> to vector<1x32xf32>
    %cst_54 = arith.constant 6.250000e-02 : f32
    %103 = vector.broadcast %cst_54 : f32 to vector<1x32xf32>
    %104 = arith.mulf %99, %103 : vector<1x32xf32>
    %cst_55 = arith.constant 6.250000e-02 : f32
    %105 = vector.broadcast %cst_55 : f32 to vector<1x32xf32>
    %106 = arith.mulf %102, %105 : vector<1x32xf32>
    %107 = arith.mulf %104, %104 : vector<1x32xf32>
    %108 = arith.subf %106, %107 : vector<1x32xf32>
    %cst_56 = arith.constant 9.99999974E-6 : f32
    %109 = vector.broadcast %cst_56 : f32 to vector<1x32xf32>
    %110 = arith.addf %108, %109 : vector<1x32xf32>
    %111 = math.rsqrt %110 : vector<1x32xf32>
    %112 = arith.mulf %93, %111 : vector<1x32xf32>
    %113 = arith.mulf %104, %112 : vector<1x32xf32>
    %114 = arith.subf %94, %113 : vector<1x32xf32>
    %115 = vector.broadcast %112 : vector<1x32xf32> to vector<16x32xf32>
    %116 = arith.mulf %97, %115 : vector<16x32xf32>
    %117 = vector.broadcast %114 : vector<1x32xf32> to vector<16x32xf32>
    %118 = arith.addf %116, %117 : vector<16x32xf32>
    %cst_57 = arith.constant 0.000000e+00 : f32
    %119 = vector.broadcast %cst_57 : f32 to vector<16x32xf32>
    %120 = arith.maximumf %118, %119 : vector<16x32xf32>
    %c3_58 = arith.constant 3 : index
    %c0_59 = arith.constant 0 : index
    %c0_60 = arith.constant 0 : index
    %121 = vector.load %arg4[%c3_58, %c0_59, %c0_60] : memref<4x64x32xf32, #tpu.memory_space<vmem>>, vector<1x64x32xf32>
    %122 = vector.shape_cast %121 : vector<1x64x32xf32> to vector<64x32xf32>
    %c4 = arith.constant 4 : index
    %c0_61 = arith.constant 0 : index
    %123 = vector.load %arg5[%c4, %c0_61] : memref<5x32xf32, #tpu.memory_space<vmem>>, vector<1x32xf32>
    %c4_62 = arith.constant 4 : index
    %c0_63 = arith.constant 0 : index
    %124 = vector.load %arg6[%c4_62, %c0_63] : memref<5x32xf32, #tpu.memory_space<vmem>>, vector<1x32xf32>
    %cst_64 = arith.constant dense<0.000000e+00> : vector<16x32xf32>
    %125 = tpu.matmul %0, %120, %cst_64 {dimension_numbers = #tpu.dot_dimension_numbers<[1], [0], [0], [1], [0, 0, 1, 1], [], []>} : vector<16x16xf32>, vector<16x32xf32>, vector<16x32xf32> -> vector<16x32xf32>
    %126 = tpu.concatenate %125, %120 in 1 : vector<16x32xf32>, vector<16x32xf32> -> vector<16x64xf32>
    %cst_65 = arith.constant dense<0.000000e+00> : vector<16x32xf32>
    %127 = tpu.matmul %126, %122, %cst_65 {dimension_numbers = #tpu.dot_dimension_numbers<[1], [0], [0], [1], [0, 0, 1, 1], [], []>} : vector<16x64xf32>, vector<64x32xf32>, vector<16x32xf32> -> vector<16x32xf32>
    %cst_66 = arith.constant dense<0.000000e+00> : vector<32xf32>
    %128 = vector.multi_reduction <add>, %127, %cst_66 [0] : vector<16x32xf32> to vector<32xf32>
    %129 = vector.shape_cast %128 : vector<32xf32> to vector<1x32xf32>
    %130 = arith.mulf %127, %127 : vector<16x32xf32>
    %cst_67 = arith.constant dense<0.000000e+00> : vector<32xf32>
    %131 = vector.multi_reduction <add>, %130, %cst_67 [0] : vector<16x32xf32> to vector<32xf32>
    %132 = vector.shape_cast %131 : vector<32xf32> to vector<1x32xf32>
    %cst_68 = arith.constant 6.250000e-02 : f32
    %133 = vector.broadcast %cst_68 : f32 to vector<1x32xf32>
    %134 = arith.mulf %129, %133 : vector<1x32xf32>
    %cst_69 = arith.constant 6.250000e-02 : f32
    %135 = vector.broadcast %cst_69 : f32 to vector<1x32xf32>
    %136 = arith.mulf %132, %135 : vector<1x32xf32>
    %137 = arith.mulf %134, %134 : vector<1x32xf32>
    %138 = arith.subf %136, %137 : vector<1x32xf32>
    %cst_70 = arith.constant 9.99999974E-6 : f32
    %139 = vector.broadcast %cst_70 : f32 to vector<1x32xf32>
    %140 = arith.addf %138, %139 : vector<1x32xf32>
    %141 = math.rsqrt %140 : vector<1x32xf32>
    %142 = arith.mulf %123, %141 : vector<1x32xf32>
    %143 = arith.mulf %134, %142 : vector<1x32xf32>
    %144 = arith.subf %124, %143 : vector<1x32xf32>
    %145 = vector.broadcast %142 : vector<1x32xf32> to vector<16x32xf32>
    %146 = arith.mulf %127, %145 : vector<16x32xf32>
    %147 = vector.broadcast %144 : vector<1x32xf32> to vector<16x32xf32>
    %148 = arith.addf %146, %147 : vector<16x32xf32>
    %cst_71 = arith.constant 0.000000e+00 : f32
    %149 = vector.broadcast %cst_71 : f32 to vector<16x32xf32>
    %150 = arith.maximumf %148, %149 : vector<16x32xf32>
    %c0_72 = arith.constant 0 : index
    %c0_73 = arith.constant 0 : index
    %151 = vector.load %arg7[%c0_72, %c0_73] : memref<2x16xf32, #tpu.memory_space<vmem>>, vector<2x16xf32>
    %cst_74 = arith.constant dense<0.000000e+00> : vector<2x32xf32>
    %152 = tpu.matmul %151, %150, %cst_74 {dimension_numbers = #tpu.dot_dimension_numbers<[1], [0], [0], [1], [0, 0, 1, 1], [], []>} : vector<2x16xf32>, vector<16x32xf32>, vector<2x32xf32> -> vector<2x32xf32>
    %c0_75 = arith.constant 0 : index
    %c0_76 = arith.constant 0 : index
    %153 = vector.load %arg8[%c0_75, %c0_76] : memref<32x3xf32, #tpu.memory_space<vmem>>, vector<32x3xf32>
    %cst_77 = arith.constant dense<0.000000e+00> : vector<2x3xf32>
    %154 = tpu.matmul %152, %153, %cst_77 {dimension_numbers = #tpu.dot_dimension_numbers<[1], [0], [0], [1], [0, 0, 1, 1], [], []>} : vector<2x32xf32>, vector<32x3xf32>, vector<2x3xf32> -> vector<2x3xf32>
    %c0_78 = arith.constant 0 : index
    %c0_79 = arith.constant 0 : index
    %155 = vector.load %arg9[%c0_78, %c0_79] : memref<1x3xf32, #tpu.memory_space<vmem>>, vector<1x3xf32>
    %156 = vector.broadcast %155 : vector<1x3xf32> to vector<2x3xf32>
    %157 = arith.addf %154, %156 : vector<2x3xf32>
    %c0_80 = arith.constant 0 : index
    %c0_81 = arith.constant 0 : index
    %158 = vector.load %arg10[%c0_80, %c0_81] : memref<2x3xf32, #tpu.memory_space<vmem>>, vector<2x3xf32>
    tpu.vector_store %arg10[%c0_80, %c0_81], %157 {strides = array<i32>} : memref<2x3xf32, #tpu.memory_space<vmem>>, vector<2x3xf32>,
    return
  }
  func.func @transform_0(%arg0: i32) -> (i32, i32) {
    %c0_i32 = arith.constant 0 : i32
    %c0_i32_0 = arith.constant 0 : i32
    %c0_i32_1 = arith.constant 0 : i32
    return %c0_i32, %c0_i32_0 : i32, i32
  }
  func.func @transform_1(%arg0: i32) -> (i32, i32) {
    %c0_i32 = arith.constant 0 : i32
    %c0_i32_0 = arith.constant 0 : i32
    %c0_i32_1 = arith.constant 0 : i32
    return %c0_i32, %c0_i32_0 : i32, i32
  }
  func.func @transform_2(%arg0: i32) -> (i32, i32) {
    %c0_i32 = arith.constant 0 : i32
    %c0_i32_0 = arith.constant 0 : i32
    %c0_i32_1 = arith.constant 0 : i32
    return %c0_i32, %c0_i32_0 : i32, i32
  }
  func.func @transform_3(%arg0: i32) -> (i32, i32, i32) {
    %c0_i32 = arith.constant 0 : i32
    %c0_i32_0 = arith.constant 0 : i32
    %c0_i32_1 = arith.constant 0 : i32
    %c0_i32_2 = arith.constant 0 : i32
    return %c0_i32, %c0_i32_0, %c0_i32_1 : i32, i32, i32
  }
  func.func @transform_4(%arg0: i32) -> (i32, i32) {
    %c0_i32 = arith.constant 0 : i32
    %c0_i32_0 = arith.constant 0 : i32
    %c0_i32_1 = arith.constant 0 : i32
    return %c0_i32, %c0_i32_0 : i32, i32
  }
  func.func @transform_5(%arg0: i32) -> (i32, i32) {
    %c0_i32 = arith.constant 0 : i32
    %c0_i32_0 = arith.constant 0 : i32
    %c0_i32_1 = arith.constant 0 : i32
    return %c0_i32, %c0_i32_0 : i32, i32
  }
  func.func @transform_6(%arg0: i32) -> (i32, i32) {
    %c0_i32 = arith.constant 0 : i32
    %c0_i32_0 = arith.constant 0 : i32
    %c0_i32_1 = arith.constant 0 : i32
    return %c0_i32, %c0_i32_0 : i32, i32
  }
  func.func @transform_7(%arg0: i32) -> (i32, i32) {
    %c0_i32 = arith.constant 0 : i32
    %c0_i32_0 = arith.constant 0 : i32
    %c0_i32_1 = arith.constant 0 : i32
    return %c0_i32, %c0_i32_0 : i32, i32
  }
  func.func @transform_8(%arg0: i32) -> (i32, i32) {
    %c0_i32 = arith.constant 0 : i32
    %c0_i32_0 = arith.constant 0 : i32
    %c0_i32_1 = arith.constant 0 : i32
    return %c0_i32, %c0_i32_0 : i32, i32
  }
  func.func @transform_9(%arg0: i32) -> (i32, i32) {
    %c0_i32 = arith.constant 0 : i32
    %c0_i32_0 = arith.constant 0 : i32
    %c0_i32_1 = arith.constant 0 : i32
    return %c0_i32, %c0_i32_0 : i32, i32
  }
}

</mosaic_0001>

<bundles_post_ra>
// kernel: tpu_custom_call.1
= control target key start
LH: loop header
LB: loop body
LE: loop exit
PB: predicated region body
PF: predicated region fallthrough
CT: control target
= control target key end

     0   :  { %vm40_vm0 = vcmask 130048   ;;  %s1698_s15 = smov 4   ;;  %s2009_s0 = inlined_call_operand.vmem [shape: f32[16,16], index: 0, kind: input, shape index: {}]   ;;  %s2010_s1 = inlined_call_operand.vmem [shape: f32[16,4], index: 1, kind: input, shape index: {}]   ;;  %s2011_s2 = inlined_call_operand.vmem [shape: f32[8,32], index: 2, kind: input, shape index: {}]   ;;  %s2012_s3 = inlined_call_operand.vmem [shape: f32[4,64,32], index: 3, kind: input, shape index: {}]   ;;  %s2013_s4 = inlined_call_operand.vmem [shape: f32[5,32], index: 4, kind: input, shape index: {}]   ;;  %s2014_s5 = inlined_call_operand.vmem [shape: f32[5,32], index: 5, kind: input, shape index: {}]   ;;  %s2015_s6 = inlined_call_operand.vmem [shape: f32[2,16], index: 6, kind: input, shape index: {}]   ;;  %s2016_s7 = inlined_call_operand.vmem [shape: f32[32,3], index: 7, kind: input, shape index: {}]   ;;  %s2017_s8 = inlined_call_operand.vmem [shape: f32[1,3], index: 8, kind: input, shape index: {}]   ;;  %s2018_s9 = inlined_call_operand.hbm [shape: f32[2,3], index: 9, kind: output, shape index: {}]  }
   0x1   :  { %v35_v0 = vld [vmem:[%s2010_s1] sm:$0xff]  ;;  %v36_v1 = vld [vmem:[%s2010_s1 + $0x8] sm:$0xff] }
   0x2   :  { %v1763_v2 = vld [vmem:[%s2009_s0] sm:$0xff]  ;;  %v1565_v3 = vpack.c.bf16 %v36_v1, %v35_v0  ;;  %124 = vrot.lane.b32.xlu0 %v35_v0, %s1698_s15 }
   0x3   :  { %1435 = vmatprep.mubr.msk.f32.mxu0 %vm40_vm0, %v1763_v2 }
   0x4   :  { %14 = vsyncpa [#allocation3], 0  ;;  %1566 = vmatprep.subr.bf16.mxu0 %v1565_v3  ;;  %v1770_v4 = vld [vmem:[%s2009_s0 + $0x8] sm:$0xff]  ;;  %v37_v5 = vld [vmem:[%s2011_s2] sm:$0xff]  ;;  %vm130_vm1 = vcmask 31744   ;;  %vm133_vm2 = vcmask 64512   ;;  %v245_v39 = vlaneseq }
   0x5   :  { %1568 = vmatpush3.bf16.msra.mxu0 %v1565_v3  ;;  %1438 = vmatprep.subr.mxu1 %v37_v5  ;;  %vm215_vm3 = vcmask 261120   ;;  %v38_v41 = vld [vmem:[%s2013_s4] sm:$0x1]  ;;  %v260_v49 = vld [vmem:[%s2012_s3 + $0x8] sm:$0xff]  ;;  %v261_v50 = vld [vmem:[%s2012_s3 + $0x10] sm:$0xff]  ;;  %s1699_s12 = smov 32  }
   0x6   :  { %126 = vrot.lane.b32.xlu0 %v36_v1, %s1698_s15  ;;  %1439 = vmatpush3.msra.mxu1 %v37_v5  ;;  %v246_v40 = vshrl.u32 %v245_v39, 7  ;;  %v39_v45 = vld [vmem:[%s2014_s5] sm:$0x1]  ;;  %v262_v52 = vld [vmem:[%s2012_s3 + $0x18] sm:$0xff]  ;;  %v264_v58 = vld [vmem:[%s2012_s3 + $0x28] sm:$0xff]  ;;  %vm354_vm4 = vcmask 523264  }
   0x7   :  { %v259_v48 = vld [vmem:[%s2012_s3] sm:$0xff]  ;;  %v1577_v56 = vpack.c.bf16 %v262_v52, %v261_v50  ;;  %v265_v3 = vld [vmem:[%s2012_s3 + $0x30] sm:$0xff]  ;;  %v266_v5 = vld [vmem:[%s2012_s3 + $0x38] sm:$0xff]  ;;  %vm1701_vm5 = vmmov 0   ;;  %s1703_s18 = smov [#allocation2]   ;;  %vm1297_vm6 = vcmask 17408  }
   0x8   :  { %1436 = vmatmul.mubr.msk.f32.vlgmr.msra.gmra.mrb[0].mxu0 %vm40_vm0, %v1770_v4  ;;  %v1786_v42 = vsub.s32 0, %v246_v40  ;;  %v1573_v51 = vpack.c.bf16 %v260_v49, %v259_v48  ;;  %v263_v57 = vld [vmem:[%s2012_s3 + $0x20] sm:$0xff]  ;;  %s1305_s0 = sshll.u32 %s1703_s18, 4  ;;  %s1306_s0 = int_to_ptr.vmem [resolvable:$true] %s1305_s0 }
   0x9   :  { %v1581_v60 = vpack.c.bf16 %v264_v58, %v263_v57  ;;  %v267_v40 = vld [vmem:[%s2013_s4 + $0x1] sm:$0x1]  ;;  %p1679_p1 = scmp.lt.s32.totalorder %s1306_s0, %s1306_s0 }
   0xa   :  { %1574 = vmatprep.subr.bf16.mxu0 %v1573_v51 }
   0xb   :  { %1576 = vmatpush3.bf16.msra.mxu0 %v1573_v51 }
   0xc   :  { %1578 = vmatprep.subr.bf16.mxu0 %v1577_v56 }
   0xf   :  { %1580 = vmatpush3.bf16.msra.mxu0 %v1577_v56 }
  0x10   :  { %1582 = vmatprep.subr.bf16.mxu0 %v1581_v60 }
  0x13   :  { %1584 = vmatpush3.bf16.msra.mxu0 %v1581_v60  ;;  %v1324_v60 = vld [vmem:[%s2012_s3 + $0x58] sm:$0xff] }
  0x74   :  { %v125_v6 = vpop.permute.xlu0 %124 }
  0x78   :  { %v127_v7 = vpop.permute.xlu0 %126 }
  0xdb   :  { %v1437_v8 = vpop.f32.mrb[0].mxu0 }
  0xdc   :  { %v113_v9 = vpop.f32.mrb[1].mxu0  ;;  %v132_v11 = vsel %vm130_vm1, %v1437_v8, %v127_v7 }
  0xdd   :  { %v131_v10 = vsel %vm130_vm1, %v113_v9, %v125_v6  ;;  %v1585_v6 = vpack.c.bf16 %v266_v5, %v265_v3  ;;  %v1328_v3 = vld [vmem:[%s2012_s3 + $0x78] sm:$0xff] }
  0xde   :  { %1440 = vmatprep.mubr.msk.f32.mxu1 %vm133_vm2, %v131_v10 }
  0xdf   :  { %1441 = vmatmul.mubr.msk.f32.vlgmr.msra.gmra.mrb[0].mxu1 %vm133_vm2, %v132_v11  ;;  %1586 = vmatprep.subr.bf16.mxu0 %v1585_v6 }
  0xe0   :  { %1447 = vmatprep.mubr.msk.f32.mxu1 %vm40_vm0, %v1763_v2  ;;  %1588 = vmatpush3.bf16.msra.mxu0 %v1585_v6 }
 0x1b2   :  { %v1442_v12 = vpop.f32.mrb[0].mxu1 }
 0x1b3   :  { %v217_v13 = vsel %vm215_vm3, %v1442_v12, 0.0  ;;  %v226_v14 = vmul.f32 %v1442_v12, %v1442_v12  ;;  %v206_v15 = vpop.f32.mrb[1].mxu1 }
 0x1b4   :  { %v216_v16 = vsel %vm215_vm3, %v206_v15, 0.0  ;;  %v225_v17 = vmul.f32 %v206_v15, %v206_v15 }
 0x1b5   :  { %v228_v18 = vsel %vm215_vm3, %v226_v14, 0.0  ;;  %v218_v19 = vadd.f32 %v217_v13, %v216_v16 }
 0x1b6   :  { %v227_v20 = vsel %vm215_vm3, %v225_v17, 0.0 }
 0x1b7   :  { %v219_v21 = vrot.slane %v218_v19, 4  ;;  %v229_v22 = vadd.f32 %v228_v18, %v227_v20 }
 0x1b9   :  { %v220_v23 = vadd.f32 %v219_v21, %v218_v19  ;;  %v230_v24 = vrot.slane %v229_v22, 4 }
 0x1bb   :  { %v221_v25 = vrot.slane %v220_v23, 2  ;;  %v231_v26 = vadd.f32 %v230_v24, %v229_v22 }
 0x1bd   :  { %v222_v27 = vadd.f32 %v221_v25, %v220_v23  ;;  %v232_v28 = vrot.slane %v231_v26, 2 }
 0x1bf   :  { %v223_v29 = vrot.slane %v222_v27, 1  ;;  %v233_v30 = vadd.f32 %v232_v28, %v231_v26 }
 0x1c1   :  { %v224_v31 = vadd.f32 %v223_v29, %v222_v27  ;;  %v234_v32 = vrot.slane %v233_v30, 1 }
 0x1c3   :  { %v235_v33 = vadd.f32 %v234_v32, %v233_v30  ;;  %v236_v34 = vmul.f32 0.0625, %v224_v31 }
 0x1c5   :  { %v237_v35 = vmul.f32 0.0625, %v235_v33  ;;  %v238_v36 = vmul.f32 %v236_v34, %v236_v34 }
 0x1c7   :  { %v239_v37 = vsub.f32 %v237_v35, %v238_v36 }
 0x1c9   :  { %v240_v38 = vadd.f32 1e-05, %v239_v37 }
 0x1cb   :  { %1664 = vrsqrt.f32 %v240_v38 }
 0x1d5   :  { %v1665_v43 = vpop.eup %1664 }
 0x1d6   :  { %v242_v44 = vmul.f32 %v1665_v43, %v38_v41 }
 0x1d8   :  { %v248_v46 = vrot.slane %v242_v44, %v1786_v42  ;;  %v243_v47 = vmul.f32 %v242_v44, %v236_v34  ;;  %v268_v44 = vld [vmem:[%s2014_s5 + $0x1] sm:$0x1] }
 0x1da   :  { %v249_v53 = vmul.f32 %v248_v46, %v206_v15  ;;  %v250_v54 = vmul.f32 %v1442_v12, %v248_v46  ;;  %v244_v55 = vsub.f32 %v39_v45, %v243_v47 }
 0x1dc   :  { %v254_v59 = vrot.slane %v244_v55, %v1786_v42 }
 0x1de   :  { %v255_v61 = vadd.f32 %v254_v59, %v249_v53  ;;  %v256_v62 = vadd.f32 %v254_v59, %v250_v54  ;;  %v1321_v53 = vld [vmem:[%s2012_s3 + $0x40] sm:$0xff]  ;;  %v1322_v54 = vld [vmem:[%s2012_s3 + $0x48] sm:$0xff]  ;;  %v1323_v59 = vld [vmem:[%s2012_s3 + $0x50] sm:$0xff] }
 0x1df   :  { %v1593_v58 = vpack.c.bf16 %v1322_v54, %v1321_v53 }
 0x1e0   :  { %v257_v63 = vmax.f32 %v255_v61, 0.0  ;;  %v258_v0 = vmax.f32 %v256_v62, 0.0  ;;  %v1597_v61 = vpack.c.bf16 %v1324_v60, %v1323_v59  ;;  %v1325_v62 = vld [vmem:[%s2012_s3 + $0x60] sm:$0xff] }
 0x1e2   :  { %346 = vrot.lane.b32.xlu1 %v257_v63, %s1699_s12  ;;  %v1569_v1 = vpack.c.bf16 %v258_v0, %v257_v63  ;;  %v1326_v63 = vld [vmem:[%s2012_s3 + $0x68] sm:$0xff] }
 0x1e4   :  { %1570 = vmatprep.subr.bf16.mxu1 %v1569_v1 }
 0x1e5   :  { %1572 = vmatpush3.bf16.msra.mxu1 %v1569_v1  ;;  %v1327_v1 = vld [vmem:[%s2012_s3 + $0x70] sm:$0xff] }
 0x1e6   :  { %348 = vrot.lane.b32.xlu1 %v258_v0, %s1699_s12  ;;  %v1601_v0 = vpack.c.bf16 %v1326_v63, %v1325_v62  ;;  %v1605_v5 = vpack.c.bf16 %v1328_v3, %v1327_v1  ;;  %v1340_v1 = vld [vmem:[%s2012_s3 + $0xb8] sm:$0xff] }
 0x1e8   :  { %1448 = vmatmul.mubr.msk.f32.vlgmr.msra.gmra.mrb[2].mxu1 %vm40_vm0, %v1770_v4 }
 0x1e9   :  { %1473 = vmatprep.mubr.msk.f32.mxu1 %vm40_vm0, %v1763_v2 }
 0x254   :  { %v347_v7 = vpop.permute.xlu1 %346 }
 0x258   :  { %v349_v10 = vpop.permute.xlu1 %348 }
 0x2bb   :  { %v1449_v8 = vpop.f32.mrb[2].mxu1 }
 0x2bc   :  { %v335_v9 = vpop.f32.mrb[3].mxu1  ;;  %v353_v12 = vsel %vm215_vm3, %v1449_v8, %v349_v10 }
 0x2bd   :  { %v352_v11 = vsel %vm215_vm3, %v335_v9, %v347_v7 }
 0x2be   :  { %1466 = vmatprep.mubr.msk.f32.mxu0 %vm354_vm4, %v352_v11 }
 0x2bf   :  { %1467 = vmatmul.mubr.msk.f32.vlgmr.msra.gmra.mrb[2].mxu0 %vm354_vm4, %v353_v12 }
 0x392   :  { %v1468_v13 = vpop.f32.mrb[2].mxu0 }
 0x393   :  { %v437_v14 = vsel %vm215_vm3, %v1468_v13, 0.0  ;;  %v446_v15 = vmul.f32 %v1468_v13, %v1468_v13  ;;  %v427_v16 = vpop.f32.mrb[3].mxu0 }
 0x394   :  { %v436_v17 = vsel %vm215_vm3, %v427_v16, 0.0  ;;  %v445_v18 = vmul.f32 %v427_v16, %v427_v16 }
 0x395   :  { %v448_v19 = vsel %vm215_vm3, %v446_v15, 0.0  ;;  %v438_v20 = vadd.f32 %v437_v14, %v436_v17 }
 0x396   :  { %v447_v21 = vsel %vm215_vm3, %v445_v18, 0.0 }
 0x397   :  { %v439_v22 = vrot.slane %v438_v20, 4  ;;  %v449_v23 = vadd.f32 %v448_v19, %v447_v21 }
 0x399   :  { %v440_v24 = vadd.f32 %v439_v22, %v438_v20  ;;  %v450_v25 = vrot.slane %v449_v23, 4 }
 0x39b   :  { %v441_v26 = vrot.slane %v440_v24, 2  ;;  %v451_v27 = vadd.f32 %v450_v25, %v449_v23 }
 0x39d   :  { %v442_v28 = vadd.f32 %v441_v26, %v440_v24  ;;  %v452_v29 = vrot.slane %v451_v27, 2 }
 0x39f   :  { %v443_v30 = vrot.slane %v442_v28, 1  ;;  %v453_v31 = vadd.f32 %v452_v29, %v451_v27 }
 0x3a1   :  { %v444_v32 = vadd.f32 %v443_v30, %v442_v28  ;;  %v454_v33 = vrot.slane %v453_v31, 1 }
 0x3a3   :  { %v455_v34 = vadd.f32 %v454_v33, %v453_v31  ;;  %v456_v35 = vmul.f32 0.0625, %v444_v32 }
 0x3a5   :  { %v457_v36 = vmul.f32 0.0625, %v455_v34  ;;  %v458_v37 = vmul.f32 %v456_v35, %v456_v35 }
 0x3a7   :  { %v459_v38 = vsub.f32 %v457_v36, %v458_v37 }
 0x3a9   :  { %v460_v39 = vadd.f32 1e-05, %v459_v38 }
 0x3ab   :  { %1666 = vrsqrt.f32 %v460_v39  ;;  %v488_v39 = vld [vmem:[%s2013_s4 + $0x2] sm:$0x1] }
 0x3b5   :  { %v1667_v41 = vpop.eup %1666 }
 0x3b6   :  { %v462_v43 = vmul.f32 %v1667_v41, %v267_v40  ;;  %v1333_v40 = vld [vmem:[%s2012_s3 + $0x80] sm:$0xff]  ;;  %v1334_v41 = vld [vmem:[%s2012_s3 + $0x88] sm:$0xff] }
 0x3b8   :  { %v463_v45 = vmul.f32 %v462_v43, %v456_v35  ;;  %v468_v46 = vrot.slane %v462_v43, %v1786_v42  ;;  %v1335_v43 = vld [vmem:[%s2012_s3 + $0x90] sm:$0xff] }
 0x3ba   :  { %v469_v47 = vmul.f32 %v468_v46, %v427_v16  ;;  %v464_v48 = vsub.f32 %v268_v44, %v463_v45  ;;  %v470_v49 = vmul.f32 %v1468_v13, %v468_v46  ;;  %v1613_v45 = vpack.c.bf16 %v1334_v41, %v1333_v40  ;;  %v1336_v46 = vld [vmem:[%s2012_s3 + $0x98] sm:$0xff]  ;;  %v709_v40 = vld [vmem:[%s2014_s5 + $0x3] sm:$0x1] }
 0x3bc   :  { %v474_v50 = vrot.slane %v464_v48, %v1786_v42  ;;  %v1617_v48 = vpack.c.bf16 %v1336_v46, %v1335_v43  ;;  %1614 = vmatprep.subr.bf16.mxu0 %v1613_v45 }
 0x3bd   :  { %1616 = vmatpush3.bf16.msra.mxu0 %v1613_v45 }
 0x3be   :  { %v476_v51 = vadd.f32 %v474_v50, %v470_v49  ;;  %v475_v52 = vadd.f32 %v474_v50, %v469_v47  ;;  %v1337_v49 = vld [vmem:[%s2012_s3 + $0xa0] sm:$0xff]  ;;  %v1338_v50 = vld [vmem:[%s2012_s3 + $0xa8] sm:$0xff]  ;;  %1618 = vmatprep.subr.bf16.mxu0 %v1617_v48 }
 0x3bf   :  { %v1621_v54 = vpack.c.bf16 %v1338_v50, %v1337_v49  ;;  %v1345_v50 = vld [vmem:[%s2012_s3 + $0xc0] sm:$0xff] }
 0x3c0   :  { %v478_v55 = vmax.f32 %v476_v51, 0.0  ;;  %v477_v56 = vmax.f32 %v475_v52, 0.0  ;;  %v489_v51 = vld [vmem:[%s2014_s5 + $0x2] sm:$0x1] }
 0x3c1   :  { %1620 = vmatpush3.bf16.msra.mxu0 %v1617_v48 }
 0x3c2   :  { %569 = vrot.lane.b32.xlu1 %v478_v55, %s1699_s12  ;;  %567 = vrot.lane.b32.xlu0 %v477_v56, %s1699_s12  ;;  %v1589_v57 = vpack.c.bf16 %v478_v55, %v477_v56 }
 0x3c3   :  { %1622 = vmatprep.subr.bf16.mxu0 %v1621_v54 }
 0x3c4   :  { %1590 = vmatprep.subr.bf16.mxu1 %v1589_v57 }
 0x3c5   :  { %1592 = vmatpush3.bf16.msra.mxu1 %v1589_v57  ;;  %1624 = vmatpush3.bf16.msra.mxu0 %v1621_v54 }
 0x3c6   :  { %1594 = vmatprep.subr.bf16.mxu1 %v1593_v58 }
 0x3c8   :  { %1474 = vmatmul.mubr.msk.f32.vlgmr.msra.gmra.mrb[4].mxu1 %vm40_vm0, %v1770_v4 }
 0x3c9   :  { %1596 = vmatpush3.bf16.msra.mxu1 %v1593_v58 }
 0x3ca   :  { %1598 = vmatprep.subr.bf16.mxu1 %v1597_v61 }
 0x3cd   :  { %1600 = vmatpush3.bf16.msra.mxu1 %v1597_v61 }
 0x3ce   :  { %1602 = vmatprep.subr.bf16.mxu1 %v1601_v0 }
 0x3d1   :  { %1604 = vmatpush3.bf16.msra.mxu1 %v1601_v0  ;;  %v1339_v0 = vld [vmem:[%s2012_s3 + $0xb0] sm:$0xff] }
 0x3d2   :  { %1606 = vmatprep.subr.bf16.mxu1 %v1605_v5  ;;  %v1625_v3 = vpack.c.bf16 %v1340_v1, %v1339_v0 }
 0x3d4   :  { %1626 = vmatprep.subr.bf16.mxu0 %v1625_v3 }
 0x3d5   :  { %1608 = vmatpush3.bf16.msra.mxu1 %v1605_v5  ;;  %1628 = vmatpush3.bf16.msra.mxu0 %v1625_v3 }
 0x434   :  { %v568_v7 = vpop.permute.xlu0 %567  ;;  %v570_v9 = vpop.permute.xlu1 %569 }
 0x49b   :  { %v1475_v6 = vpop.f32.mrb[4].mxu1 }
 0x49c   :  { %v556_v8 = vpop.f32.mrb[5].mxu1  ;;  %v574_v11 = vsel %vm215_vm3, %v1475_v6, %v570_v9 }
 0x49d   :  { %v573_v10 = vsel %vm215_vm3, %v556_v8, %v568_v7 }
 0x49e   :  { %1492 = vmatprep.mubr.msk.f32.mxu1 %vm354_vm4, %v573_v10 }
 0x49f   :  { %1493 = vmatmul.mubr.msk.f32.vlgmr.msra.gmra.mrb[6].mxu1 %vm354_vm4, %v574_v11 }
 0x4a0   :  { %1499 = vmatprep.mubr.msk.f32.mxu1 %vm40_vm0, %v1763_v2 }
 0x572   :  { %v1494_v12 = vpop.f32.mrb[6].mxu1 }
 0x573   :  { %v657_v13 = vsel %vm215_vm3, %v1494_v12, 0.0  ;;  %v666_v14 = vmul.f32 %v1494_v12, %v1494_v12  ;;  %v647_v15 = vpop.f32.mrb[7].mxu1 }
 0x574   :  { %v656_v16 = vsel %vm215_vm3, %v647_v15, 0.0  ;;  %v665_v17 = vmul.f32 %v647_v15, %v647_v15 }
 0x575   :  { %v668_v18 = vsel %vm215_vm3, %v666_v14, 0.0  ;;  %v658_v19 = vadd.f32 %v657_v13, %v656_v16 }
 0x576   :  { %v667_v20 = vsel %vm215_vm3, %v665_v17, 0.0 }
 0x577   :  { %v659_v21 = vrot.slane %v658_v19, 4  ;;  %v669_v22 = vadd.f32 %v668_v18, %v667_v20 }
 0x579   :  { %v660_v23 = vadd.f32 %v659_v21, %v658_v19  ;;  %v670_v24 = vrot.slane %v669_v22, 4 }
 0x57b   :  { %v661_v25 = vrot.slane %v660_v23, 2  ;;  %v671_v26 = vadd.f32 %v670_v24, %v669_v22 }
 0x57d   :  { %v662_v27 = vadd.f32 %v661_v25, %v660_v23  ;;  %v672_v28 = vrot.slane %v671_v26, 2 }
 0x57f   :  { %v663_v29 = vrot.slane %v662_v27, 1  ;;  %v673_v30 = vadd.f32 %v672_v28, %v671_v26 }
 0x581   :  { %v664_v31 = vadd.f32 %v663_v29, %v662_v27  ;;  %v674_v32 = vrot.slane %v673_v30, 1 }
 0x583   :  { %v675_v33 = vadd.f32 %v674_v32, %v673_v30  ;;  %v676_v34 = vmul.f32 0.0625, %v664_v31 }
 0x585   :  { %v677_v35 = vmul.f32 0.0625, %v675_v33  ;;  %v678_v36 = vmul.f32 %v676_v34, %v676_v34 }
 0x587   :  { %v679_v37 = vsub.f32 %v677_v35, %v678_v36 }
 0x589   :  { %v680_v38 = vadd.f32 1e-05, %v679_v37  ;;  %v708_v37 = vld [vmem:[%s2013_s4 + $0x3] sm:$0x1] }
 0x58b   :  { %1668 = vrsqrt.f32 %v680_v38 }
 0x595   :  { %v1669_v44 = vpop.eup %1668 }
 0x596   :  { %v682_v47 = vmul.f32 %v1669_v44, %v488_v39 }
 0x598   :  { %v683_v52 = vmul.f32 %v682_v47, %v676_v34  ;;  %v688_v53 = vrot.slane %v682_v47, %v1786_v42 }
 0x59a   :  { %v689_v55 = vmul.f32 %v688_v53, %v647_v15  ;;  %v684_v56 = vsub.f32 %v489_v51, %v683_v52  ;;  %v690_v57 = vmul.f32 %v1494_v12, %v688_v53  ;;  %v1346_v51 = vld [vmem:[%s2012_s3 + $0xc8] sm:$0xff] }
 0x59c   :  { %v694_v58 = vrot.slane %v684_v56, %v1786_v42  ;;  %v1347_v56 = vld [vmem:[%s2012_s3 + $0xd0] sm:$0xff] }
 0x59e   :  { %v696_v59 = vadd.f32 %v694_v58, %v690_v57  ;;  %v695_v60 = vadd.f32 %v694_v58, %v689_v55  ;;  %v1633_v55 = vpack.c.bf16 %v1346_v51, %v1345_v50  ;;  %v1348_v57 = vld [vmem:[%s2012_s3 + $0xd8] sm:$0xff]  ;;  %v1213_v51 = vld [vmem:[%s2016_s7] sm:$0xff] }
 0x59f   :  { %v1637_v58 = vpack.c.bf16 %v1348_v57, %v1347_v56  ;;  %v1216_v56 = vld [vmem:[%s2016_s7 + $0x18] sm:$0xff] }
 0x5a0   :  { %v698_v61 = vmax.f32 %v696_v59, 0.0  ;;  %v697_v62 = vmax.f32 %v695_v60, 0.0  ;;  %v1349_v59 = vld [vmem:[%s2012_s3 + $0xe0] sm:$0xff]  ;;  %v1350_v60 = vld [vmem:[%s2012_s3 + $0xe8] sm:$0xff] }
 0x5a2   :  { %789 = vrot.lane.b32.xlu1 %v698_v61, %s1699_s12  ;;  %787 = vrot.lane.b32.xlu0 %v697_v62, %s1699_s12  ;;  %v1609_v63 = vpack.c.bf16 %v698_v61, %v697_v62  ;;  %v1641_v61 = vpack.c.bf16 %v1350_v60, %v1349_v59  ;;  %v1351_v62 = vld [vmem:[%s2012_s3 + $0xf0] sm:$0xff]  ;;  %v1358_v60 = vld [vmem:[%s2017_s8] ss:$0 sm:$0xff] }
 0x5a4   :  { %1610 = vmatprep.subr.bf16.mxu1 %v1609_v63 }
 0x5a5   :  { %1612 = vmatpush3.bf16.msra.mxu1 %v1609_v63  ;;  %v1352_v63 = vld [vmem:[%s2012_s3 + $0xf8] sm:$0xff] }
 0x5a6   :  { %v1645_v0 = vpack.c.bf16 %v1352_v63, %v1351_v62 }
 0x5a8   :  { %1500 = vmatmul.mubr.msk.f32.vlgmr.msra.gmra.mrb[8].mxu1 %vm40_vm0, %v1770_v4 }
 0x5a9   :  { %1525 = vmatprep.mubr.msk.f32.mxu1 %vm40_vm0, %v1763_v2 }
 0x614   :  { %v788_v6 = vpop.permute.xlu0 %787  ;;  %v790_v8 = vpop.permute.xlu1 %789 }
 0x67b   :  { %v1501_v5 = vpop.f32.mrb[8].mxu1 }
 0x67c   :  { %v776_v7 = vpop.f32.mrb[9].mxu1  ;;  %v794_v10 = vsel %vm215_vm3, %v1501_v5, %v790_v8  ;;  %v1700_v8 = vmov 0.0|0.0  }
 0x67d   :  { %v793_v9 = vsel %vm215_vm3, %v776_v7, %v788_v6  ;;  %1649 = vmatprep.subr.bf16.mxu0 %v1700_v8 }
 0x67e   :  { %1518 = vmatprep.mubr.msk.f32.mxu0 %vm354_vm4, %v793_v9  ;;  %v1702_v9 = vmov 0.0  }
 0x67f   :  { %1519 = vmatmul.mubr.msk.f32.vlgmr.msra.gmra.mrb[4].mxu0 %vm354_vm4, %v794_v10 }
 0x680   :  { %1551 = vmatprep.mubr.msk.f32.mxu0 %vm1701_vm5, %v1702_v9 }
 0x752   :  { %v1520_v2 = vpop.f32.mrb[4].mxu0 }
 0x753   :  { %v877_v11 = vsel %vm215_vm3, %v1520_v2, 0.0  ;;  %v886_v12 = vmul.f32 %v1520_v2, %v1520_v2  ;;  %v867_v13 = vpop.f32.mrb[5].mxu0 }
 0x754   :  { %v876_v14 = vsel %vm215_vm3, %v867_v13, 0.0  ;;  %v885_v15 = vmul.f32 %v867_v13, %v867_v13 }
 0x755   :  { %v888_v16 = vsel %vm215_vm3, %v886_v12, 0.0  ;;  %v878_v17 = vadd.f32 %v877_v11, %v876_v14 }
 0x756   :  { %v887_v18 = vsel %vm215_vm3, %v885_v15, 0.0 }
 0x757   :  { %v879_v19 = vrot.slane %v878_v17, 4  ;;  %v889_v20 = vadd.f32 %v888_v16, %v887_v18 }
 0x759   :  { %v880_v21 = vadd.f32 %v879_v19, %v878_v17  ;;  %v890_v22 = vrot.slane %v889_v20, 4 }
 0x75b   :  { %v881_v23 = vrot.slane %v880_v21, 2  ;;  %v891_v24 = vadd.f32 %v890_v22, %v889_v20 }
 0x75d   :  { %v882_v25 = vadd.f32 %v881_v23, %v880_v21  ;;  %v892_v26 = vrot.slane %v891_v24, 2 }
 0x75f   :  { %v883_v27 = vrot.slane %v882_v25, 1  ;;  %v893_v28 = vadd.f32 %v892_v26, %v891_v24 }
 0x761   :  { %v884_v29 = vadd.f32 %v883_v27, %v882_v25  ;;  %v894_v30 = vrot.slane %v893_v28, 1 }
 0x763   :  { %v895_v31 = vadd.f32 %v894_v30, %v893_v28  ;;  %v896_v32 = vmul.f32 0.0625, %v884_v29 }
 0x765   :  { %v897_v33 = vmul.f32 0.0625, %v895_v31  ;;  %v898_v34 = vmul.f32 %v896_v32, %v896_v32 }
 0x767   :  { %v899_v35 = vsub.f32 %v897_v33, %v898_v34 }
 0x769   :  { %v900_v36 = vadd.f32 1e-05, %v899_v35 }
 0x76b   :  { %1670 = vrsqrt.f32 %v900_v36  ;;  %v928_v36 = vld [vmem:[%s2013_s4 + $0x4] sm:$0x1] }
 0x775   :  { %v1671_v38 = vpop.eup %1670 }
 0x776   :  { %v902_v39 = vmul.f32 %v1671_v38, %v708_v37 }
 0x778   :  { %v903_v41 = vmul.f32 %v902_v39, %v896_v32  ;;  %v908_v43 = vrot.slane %v902_v39, %v1786_v42  ;;  %v929_v39 = vld [vmem:[%s2014_s5 + $0x4] sm:$0x1] }
 0x77a   :  { %v909_v44 = vmul.f32 %v908_v43, %v867_v13  ;;  %v904_v45 = vsub.f32 %v709_v40, %v903_v41  ;;  %v910_v46 = vmul.f32 %v1520_v2, %v908_v43 }
 0x77c   :  { %v914_v47 = vrot.slane %v904_v45, %v1786_v42 }
 0x77e   :  { %v916_v48 = vadd.f32 %v914_v47, %v910_v46  ;;  %v915_v49 = vadd.f32 %v914_v47, %v909_v44 }
 0x780   :  { %v918_v52 = vmax.f32 %v916_v48, 0.0  ;;  %v917_v53 = vmax.f32 %v915_v49, 0.0 }
 0x782   :  { %1009 = vrot.lane.b32.xlu1 %v918_v52, %s1699_s12  ;;  %1007 = vrot.lane.b32.xlu0 %v917_v53, %s1699_s12  ;;  %v1629_v54 = vpack.c.bf16 %v918_v52, %v917_v53  ;;  %v1214_v52 = vld [vmem:[%s2016_s7 + $0x8] sm:$0xff] }
 0x784   :  { %1630 = vmatprep.subr.bf16.mxu1 %v1629_v54 }
 0x785   :  { %1632 = vmatpush3.bf16.msra.mxu1 %v1629_v54  ;;  %v1139_v54 = vld [vmem:[%s2015_s6] sm:$0x3] }
 0x786   :  { %1634 = vmatprep.subr.bf16.mxu1 %v1633_v55 }
 0x788   :  { %1526 = vmatmul.mubr.msk.f32.vlgmr.msra.gmra.mrb[10].mxu1 %vm40_vm0, %v1770_v4 }
 0x789   :  { %1636 = vmatpush3.bf16.msra.mxu1 %v1633_v55  ;;  %v1653_v55 = vpack.c.bf16 %v1214_v52, %v1213_v51 }
 0x78a   :  { %1638 = vmatprep.subr.bf16.mxu1 %v1637_v58 }
 0x78d   :  { %1640 = vmatpush3.bf16.msra.mxu1 %v1637_v58 }
 0x78e   :  { %1642 = vmatprep.subr.bf16.mxu1 %v1641_v61 }
 0x791   :  { %1644 = vmatpush3.bf16.msra.mxu1 %v1641_v61 }
 0x792   :  { %1646 = vmatprep.subr.bf16.mxu1 %v1645_v0 }
 0x795   :  { %1648 = vmatpush3.bf16.msra.mxu1 %v1645_v0 }
 0x7f4   :  { %v1008_v3 = vpop.permute.xlu0 %1007  ;;  %v1010_v5 = vpop.permute.xlu1 %1009 }
 0x85b   :  { %v1527_v1 = vpop.f32.mrb[10].mxu1 }
 0x85c   :  { %v996_v4 = vpop.f32.mrb[11].mxu1  ;;  %v1014_v7 = vsel %vm215_vm3, %v1527_v1, %v1010_v5 }
 0x85d   :  { %v1013_v6 = vsel %vm215_vm3, %v996_v4, %v1008_v3 }
 0x85e   :  { %1544 = vmatprep.mubr.msk.f32.mxu1 %vm354_vm4, %v1013_v6 }
 0x85f   :  { %1545 = vmatmul.mubr.msk.f32.vlgmr.msra.gmra.mrb[12].mxu1 %vm354_vm4, %v1014_v7 }
 0x932   :  { %v1546_v10 = vpop.f32.mrb[12].mxu1 }
 0x933   :  { %v1097_v2 = vsel %vm215_vm3, %v1546_v10, 0.0  ;;  %v1106_v11 = vmul.f32 %v1546_v10, %v1546_v10  ;;  %v1087_v12 = vpop.f32.mrb[13].mxu1 }
 0x934   :  { %v1096_v13 = vsel %vm215_vm3, %v1087_v12, 0.0  ;;  %v1105_v14 = vmul.f32 %v1087_v12, %v1087_v12 }
 0x935   :  { %v1108_v15 = vsel %vm215_vm3, %v1106_v11, 0.0  ;;  %v1098_v16 = vadd.f32 %v1097_v2, %v1096_v13 }
 0x936   :  { %v1107_v17 = vsel %vm215_vm3, %v1105_v14, 0.0 }
 0x937   :  { %v1099_v18 = vrot.slane %v1098_v16, 4  ;;  %v1109_v19 = vadd.f32 %v1108_v15, %v1107_v17 }
 0x939   :  { %v1100_v20 = vadd.f32 %v1099_v18, %v1098_v16  ;;  %v1110_v21 = vrot.slane %v1109_v19, 4 }
 0x93b   :  { %v1101_v22 = vrot.slane %v1100_v20, 2  ;;  %v1111_v23 = vadd.f32 %v1110_v21, %v1109_v19 }
 0x93d   :  { %v1102_v24 = vadd.f32 %v1101_v22, %v1100_v20  ;;  %v1112_v25 = vrot.slane %v1111_v23, 2 }
 0x93f   :  { %v1103_v26 = vrot.slane %v1102_v24, 1  ;;  %v1113_v27 = vadd.f32 %v1112_v25, %v1111_v23 }
 0x941   :  { %v1104_v28 = vadd.f32 %v1103_v26, %v1102_v24  ;;  %v1114_v29 = vrot.slane %v1113_v27, 1 }
 0x943   :  { %v1115_v30 = vadd.f32 %v1114_v29, %v1113_v27  ;;  %v1116_v31 = vmul.f32 0.0625, %v1104_v28 }
 0x945   :  { %v1117_v32 = vmul.f32 0.0625, %v1115_v30  ;;  %v1118_v33 = vmul.f32 %v1116_v31, %v1116_v31 }
 0x947   :  { %v1119_v34 = vsub.f32 %v1117_v32, %v1118_v33 }
 0x949   :  { %v1120_v35 = vadd.f32 1e-05, %v1119_v34 }
 0x94b   :  { %1672 = vrsqrt.f32 %v1120_v35 }
 0x955   :  { %v1673_v37 = vpop.eup %1672 }
 0x956   :  { %v1122_v38 = vmul.f32 %v1673_v37, %v928_v36 }
 0x958   :  { %v1123_v40 = vmul.f32 %v1122_v38, %v1116_v31  ;;  %v1128_v41 = vrot.slane %v1122_v38, %v1786_v42 }
 0x95a   :  { %v1124_v43 = vsub.f32 %v929_v39, %v1123_v40  ;;  %v1129_v44 = vmul.f32 %v1128_v41, %v1087_v12  ;;  %v1130_v45 = vmul.f32 %v1546_v10, %v1128_v41 }
 0x95c   :  { %v1134_v46 = vrot.slane %v1124_v43, %v1786_v42  ;;  %v1215_v42 = vld [vmem:[%s2016_s7 + $0x10] sm:$0xff]  ;;  %s1674_s7 = scalar_lea.vmem %s1306_s0, 32 }
 0x95d   :  { %v1656_v57 = vpack.c.bf16 %v1216_v56, %v1215_v42  ;;  %p1675_p0 = scmp.ne.s32.totalorder %s1306_s0, %s1674_s7  ;;  %p1680_p2 = scmp.lt.s32.totalorder %s1674_s7, %s1674_s7 }
 0x95e   :  { %v1135_v47 = vadd.f32 %v1134_v46, %v1129_v44  ;;  %v1136_v48 = vadd.f32 %v1134_v46, %v1130_v45 }
 0x95f   :  { %p1681_p3 = por %p1680_p2, %p1679_p1 }
 0x960   :  { %v1137_v49 = vmax.f32 %v1135_v47, 0.0  ;;  %v1138_v50 = vmax.f32 %v1136_v48, 0.0 }
 0x961   :  { %p1682_p4 = pnand %p1681_p3, %p1675_p0 }
 0x962   :  { %v1650_v53 = vpack.c.bf16 %v1138_v50, %v1137_v49 }
 0x964   :  { %1651 = vmatpush3.bf16.msra.mxu0 %v1650_v53 }
 0x965   :  { %1652 = vmatprep.subr.bf16.mxu0 %v1700_v8 }
 0x967   :  { %1552 = vmatmul.mubr.msk.f32.vlgmr.msra.gmra.mrb[6].mxu0 %vm40_vm0, %v1139_v54 }
 0x968   :  { %1654 = vmatpush3.bf16.msra.mxu0 %v1653_v55  ;;  %1562 = vmatprep.mubr.msk.f32.mxu0 %vm1701_vm5, %v1702_v9 }
 0x969   :  { %1655 = vmatprep.subr.bf16.mxu0 %v1700_v8 }
 0x96c   :  { %1657 = vmatpush3.bf16.msra.mxu0 %v1656_v57 }
 0xa3a   :  { %v1209_v58 = vpop.f32.mrb[6].mxu0 }
 0xa3b   :  { %v1553_v59 = vpop.f32.mrb[7].mxu0  ;;  %1563 = vmatmul.mubr.msk.f32.vlgmr.msra.gmra.mrb[8].mxu0 %vm215_vm3, %v1209_v58 }
 0xb0e   :  { %v1293_v61 = vpop.f32.mrb[8].mxu0 }
 0xb0f   :  { %v1294_v62 = vadd.f32 %v1358_v60, %v1293_v61  ;;  %v1564_v63 = vpop.f32.mrb[9].mxu0 }
 0xb11   :  { %1298 = vst.msk [vmem:[#allocation2] sm:$0x3] %vm1297_vm6, %v1294_v62 }
 0xb12   :  { %1685 = shalt.err (!%p1682_p4)
}
 0xb13   :  { %s1686_s20 = scalar_lea.hbm %s2018_s9, 32 }
 0xb14   :  { %p1687_p5 = scmp.ne.s32.totalorder %s2018_s9, %s1686_s20  ;;  %p1690_p6 = scmp.lt.u32.totalorder %s1686_s20, %s2018_s9 }
 0xb16   :  { %p1692_p7 = pnand %p1690_p6, %p1687_p5 }
 0xb18   :  { %1695 = shalt.err (!%p1692_p7)
}
 0xb19   :  { %1308 = dma.vmem_to_hbm [thread:$0]  %s1306_s0, 32, %s2018_s9, [#allocation3]  }
 0xb1a   :  { %1696 = dma.done.wait [#allocation3], 32  }
 0xb1b   :  { %1697 = vsyncadd [#allocation3], 4294967264 }
 0xb1c   :  { %1312 = vsyncpa [#allocation3], 1 }

</bundles_post_ra>
